<compile_context>
chip_gen: v6e
topology: v6e:2x2x1
jax: 0.10.0
libtpu: 0.0.40
codegen_flags: <defaults>
</compile_context>

<pallas_src>
import functools

import jax
import jax.numpy as jnp
from jax.experimental import pallas as pl
from jax.experimental.pallas import tpu as pltpu

INPUT_SIZE = 784
HIDDEN_SIZE = 128
NUM_CLASSES = 10

N_PAD = 128   # lane-dense padded output width (>= NUM_CLASSES)


def _round_up(n, m):
    return ((n + m - 1) // m) * m


def _choose_tile(B, tm):
    """Pick a batch tile: multiple of 16, not over-tiling tiny batches, and
    giving the 'parallel' batch axis >= 2 grid steps for mid/large batches
    (v7x has 2 TensorCores)."""
    tile = min(tm, _round_up(B, 16))
    if B >= 512 and B <= tile:
        tile = _round_up((B + 1) // 2, 16)
    return tile


def _mlp_kernel(x_ref, w1_ref, b1_ref, w2_ref, b2_ref, o_ref):
    # x_ref : (tm, 784)   f32/bf16 VMEM (raw input, cast here)
    # w1_ref: (784, 128)  bf16     VMEM
    # b1_ref: (1, 128)    f32      VMEM
    # w2_ref: (128, 128)  bf16     VMEM (zero-padded beyond column 10)
    # b2_ref: (1, 128)    f32      VMEM (zero-padded beyond column 10)
    # o_ref : (tm, 128)   bf16     VMEM (lane-dense, unmasked stores)

    # Cast activations to bf16 on the VPU right before the MXU (free work
    # under the DMA bottleneck; no-op if the caller already supplies bf16).
    x = x_ref[...].astype(jnp.bfloat16)
    # Layer 1 on the MXU: bf16 inputs, f32 accumulation.
    h = jnp.dot(x, w1_ref[...], preferred_element_type=jnp.float32)
    # Bias + ReLU on the f32 accumulator (VPU).
    h = jnp.maximum(h + b1_ref[...], 0.0)
    # Layer 2 on the MXU: cast activations back to bf16, accumulate in f32.
    out = jnp.dot(h.astype(jnp.bfloat16), w2_ref[...],
                  preferred_element_type=jnp.float32)
    # Bias in f32, single bf16 round at the store (halves output writeback).
    o_ref[...] = (out + b2_ref[...]).astype(o_ref.dtype)


def prepare_params(w1, b1, w2, b2):
    """One-time (init-time) padding / casting of the parameters.

    w1: (784, 128), b1: (1, 128)   (weights stored (in, out), i.e. PyTorch W.T)
    w2: (128, 10),  b2: (1, 10)
    """
    w1_p = w1.astype(jnp.bfloat16)                                  # (784, 128)
    b1_p = b1.astype(jnp.float32).reshape(1, HIDDEN_SIZE)           # (1, 128)
    w2_p = jnp.zeros((HIDDEN_SIZE, N_PAD), jnp.bfloat16)
    w2_p = w2_p.at[:, :NUM_CLASSES].set(w2.astype(jnp.bfloat16))    # (128, 128)
    b2_p = jnp.zeros((1, N_PAD), jnp.float32)
    b2_p = b2_p.at[:, :NUM_CLASSES].set(
        b2.astype(jnp.float32).reshape(1, NUM_CLASSES))              # (1, 128)
    return w1_p, b1_p, w2_p, b2_p


@functools.partial(jax.jit, static_argnames=("tm",))
def neural_net_forward(x, w1_p, b1_p, w2_p, b2_p, *, tm=2048):
    """Fused Linear -> ReLU -> Linear forward pass.

    x:  (B, 784) float32 or bfloat16
    w1_p/b1_p/w2_p/b2_p: prepared via prepare_params()
    returns (B, 10) float32 logits
    """
    B, D = x.shape
    assert D == INPUT_SIZE

    tm_eff = _choose_tile(B, tm)
    Bp = _round_up(B, tm_eff)

    # Only pad the batch axis if needed (no copy in the common case).
    if Bp != B:
        x_p = jnp.zeros((Bp, INPUT_SIZE), x.dtype).at[:B, :].set(x)
    else:
        x_p = x

    grid = (Bp // tm_eff,)
    out_padded = pl.pallas_call(
        _mlp_kernel,
        out_shape=jax.ShapeDtypeStruct((Bp, N_PAD), jnp.bfloat16),
        grid_spec=pltpu.PrefetchScalarGridSpec(
            num_scalar_prefetch=0,
            grid=grid,
            in_specs=[
                # Activations: tile over batch; full-K block (784 == full dim).
                pl.BlockSpec((tm_eff, INPUT_SIZE), lambda i: (i, 0)),
                # Parameters: whole tensors, identical for every grid step
                # (Pallas keeps them resident in VMEM).
                pl.BlockSpec((INPUT_SIZE, HIDDEN_SIZE), lambda i: (0, 0)),
                pl.BlockSpec((1, HIDDEN_SIZE), lambda i: (0, 0)),
                pl.BlockSpec((HIDDEN_SIZE, N_PAD), lambda i: (0, 0)),
                pl.BlockSpec((1, N_PAD), lambda i: (0, 0)),
            ],
            # Lane-dense (128-wide) output block -> unmasked vector stores.
            out_specs=pl.BlockSpec((tm_eff, N_PAD), lambda i: (i, 0)),
        ),
        compiler_params=pltpu.CompilerParams(
            dimension_semantics=("parallel",),
            vmem_limit_bytes=32 * 1024 * 1024,
        ),
    )(x_p, w1_p, b1_p, w2_p, b2_p)

    # Strip batch / class padding and return f32 logits (module semantics).
    return out_padded[:B, :NUM_CLASSES].astype(jnp.float32)


def init_params(key):
    """Deterministic parameter init mimicking nn.Linear's default
    (uniform(-1/sqrt(fan_in), 1/sqrt(fan_in)))."""
    k1, k2, k3, k4 = jax.random.split(key, 4)
    bound1 = 1.0 / jnp.sqrt(float(INPUT_SIZE))
    bound2 = 1.0 / jnp.sqrt(float(HIDDEN_SIZE))
    # Stored already transposed relative to PyTorch: (in, out).
    w1 = jax.random.uniform(k1, (INPUT_SIZE, HIDDEN_SIZE), jnp.float32,
                            minval=-bound1, maxval=bound1)
    b1 = jax.random.uniform(k2, (1, HIDDEN_SIZE), jnp.float32,
                            minval=-bound1, maxval=bound1)
    w2 = jax.random.uniform(k3, (HIDDEN_SIZE, NUM_CLASSES), jnp.float32,
                            minval=-bound2, maxval=bound2)
    b2 = jax.random.uniform(k4, (1, NUM_CLASSES), jnp.float32,
                            minval=-bound2, maxval=bound2)
    return w1, b1, w2, b2


if __name__ == "__main__":
    key = jax.random.PRNGKey(0)
    kx, kp = jax.random.split(key)

    batch = 8
    x = jax.random.normal(kx, (batch, INPUT_SIZE), jnp.float32)
    w1, b1, w2, b2 = init_params(kp)
    params = prepare_params(w1, b1, w2, b2)   # one-time pad/cast, outside jit

    logits = neural_net_forward(x, *params)
    logits = jax.block_until_ready(logits)
    assert logits.shape == (batch, NUM_CLASSES)

    # Reference in plain JAX with the same bf16-matmul / f32-accumulate recipe.
    xb = x.astype(jnp.bfloat16)
    w1b = w1.astype(jnp.bfloat16)
    w2b = w2.astype(jnp.bfloat16)
    h_ref = jnp.maximum(
        jnp.dot(xb, w1b, preferred_element_type=jnp.float32) + b1, 0.0)
    ref = jnp.dot(h_ref.astype(jnp.bfloat16), w2b,
                  preferred_element_type=jnp.float32) + b2
    assert jnp.allclose(logits, ref, atol=1e-2, rtol=1e-2), (
        float(jnp.max(jnp.abs(logits - ref))))

    # Loose sanity check against full-f32 math (module semantics).
    ref_f32 = jnp.maximum(x @ w1 + b1, 0.0) @ w2 + b2
    assert jnp.allclose(logits, ref_f32, atol=5e-2, rtol=5e-2), (
        float(jnp.max(jnp.abs(logits - ref_f32))))

    print("KERNEL_OK")
</pallas_src>

<mosaic_0001>
module attributes {stable_mosaic.version = 11 : i64} {
  func.func @_mlp_kernel(%arg0: i32, %arg1: memref<16x784xf32, #tpu.memory_space<vmem>>, %arg2: memref<784x128xbf16, #tpu.memory_space<vmem>>, %arg3: memref<1x128xf32, #tpu.memory_space<vmem>>, %arg4: memref<128x128xbf16, #tpu.memory_space<vmem>>, %arg5: memref<1x128xf32, #tpu.memory_space<vmem>>, %arg6: memref<16x128xbf16, #tpu.memory_space<vmem>>) attributes {dimension_semantics = [#tpu.dimension_semantics<parallel>], iteration_bounds = array<i64: 1>, scalar_prefetch = 0 : i64, scratch_operands = 0 : i64, tpu.core_type = #tpu.core_type<tc>, window_params = [{transform_indices = @transform_0, window_bounds = array<i64: 16, 784>}, {pipeline_mode = #tpu.pipeline_mode<synchronous>, transform_indices = @transform_1, window_bounds = array<i64: 784, 128>}, {pipeline_mode = #tpu.pipeline_mode<synchronous>, transform_indices = @transform_2, window_bounds = array<i64: 1, 128>}, {pipeline_mode = #tpu.pipeline_mode<synchronous>, transform_indices = @transform_3, window_bounds = array<i64: 128, 128>}, {pipeline_mode = #tpu.pipeline_mode<synchronous>, transform_indices = @transform_4, window_bounds = array<i64: 1, 128>}, {transform_indices = @transform_5, window_bounds = array<i64: 16, 128>}]} {
    %c0 = arith.constant 0 : index
    %c0_0 = arith.constant 0 : index
    %0 = vector.load %arg1[%c0, %c0_0] : memref<16x784xf32, #tpu.memory_space<vmem>>, vector<16x784xf32>
    %1 = arith.truncf %0 : vector<16x784xf32> to vector<16x784xbf16>
    %c0_1 = arith.constant 0 : index
    %c0_2 = arith.constant 0 : index
    %2 = vector.load %arg2[%c0_1, %c0_2] : memref<784x128xbf16, #tpu.memory_space<vmem>>, vector<784x128xbf16>
    %cst = arith.constant dense<0.000000e+00> : vector<16x128xf32>
    %3 = tpu.matmul %1, %2, %cst {dimension_numbers = #tpu.dot_dimension_numbers<[1], [0], [0], [1], [0, 0, 1, 1], [], []>} : vector<16x784xbf16>, vector<784x128xbf16>, vector<16x128xf32> -> vector<16x128xf32>
    %c0_3 = arith.constant 0 : index
    %c0_4 = arith.constant 0 : index
    %4 = vector.load %arg3[%c0_3, %c0_4] : memref<1x128xf32, #tpu.memory_space<vmem>>, vector<1x128xf32>
    %5 = vector.broadcast %4 : vector<1x128xf32> to vector<16x128xf32>
    %6 = arith.addf %3, %5 : vector<16x128xf32>
    %cst_5 = arith.constant 0.000000e+00 : f32
    %7 = vector.broadcast %cst_5 : f32 to vector<16x128xf32>
    %8 = arith.maximumf %6, %7 : vector<16x128xf32>
    %9 = arith.truncf %8 : vector<16x128xf32> to vector<16x128xbf16>
    %c0_6 = arith.constant 0 : index
    %c0_7 = arith.constant 0 : index
    %10 = vector.load %arg4[%c0_6, %c0_7] : memref<128x128xbf16, #tpu.memory_space<vmem>>, vector<128x128xbf16>
    %cst_8 = arith.constant dense<0.000000e+00> : vector<16x128xf32>
    %11 = tpu.matmul %9, %10, %cst_8 {dimension_numbers = #tpu.dot_dimension_numbers<[1], [0], [0], [1], [0, 0, 1, 1], [], []>} : vector<16x128xbf16>, vector<128x128xbf16>, vector<16x128xf32> -> vector<16x128xf32>
    %c0_9 = arith.constant 0 : index
    %c0_10 = arith.constant 0 : index
    %12 = vector.load %arg5[%c0_9, %c0_10] : memref<1x128xf32, #tpu.memory_space<vmem>>, vector<1x128xf32>
    %13 = vector.broadcast %12 : vector<1x128xf32> to vector<16x128xf32>
    %14 = arith.addf %11, %13 : vector<16x128xf32>
    %15 = arith.truncf %14 : vector<16x128xf32> to vector<16x128xbf16>
    %c0_11 = arith.constant 0 : index
    %c0_12 = arith.constant 0 : index
    %16 = vector.load %arg6[%c0_11, %c0_12] : memref<16x128xbf16, #tpu.memory_space<vmem>>, vector<16x128xbf16>
    tpu.vector_store %arg6[%c0_11, %c0_12], %15 {strides = array<i32>} : memref<16x128xbf16, #tpu.memory_space<vmem>>, vector<16x128xbf16>,
    return
  }
  func.func @transform_0(%arg0: i32) -> (i32, i32) {
    %c0_i32 = arith.constant 0 : i32
    %c0_i32_0 = arith.constant 0 : i32
    return %arg0, %c0_i32 : i32, i32
  }
  func.func @transform_1(%arg0: i32) -> (i32, i32) {
    %c0_i32 = arith.constant 0 : i32
    %c0_i32_0 = arith.constant 0 : i32
    %c0_i32_1 = arith.constant 0 : i32
    return %c0_i32, %c0_i32_0 : i32, i32
  }
  func.func @transform_2(%arg0: i32) -> (i32, i32) {
    %c0_i32 = arith.constant 0 : i32
    %c0_i32_0 = arith.constant 0 : i32
    %c0_i32_1 = arith.constant 0 : i32
    return %c0_i32, %c0_i32_0 : i32, i32
  }
  func.func @transform_3(%arg0: i32) -> (i32, i32) {
    %c0_i32 = arith.constant 0 : i32
    %c0_i32_0 = arith.constant 0 : i32
    %c0_i32_1 = arith.constant 0 : i32
    return %c0_i32, %c0_i32_0 : i32, i32
  }
  func.func @transform_4(%arg0: i32) -> (i32, i32) {
    %c0_i32 = arith.constant 0 : i32
    %c0_i32_0 = arith.constant 0 : i32
    %c0_i32_1 = arith.constant 0 : i32
    return %c0_i32, %c0_i32_0 : i32, i32
  }
  func.func @transform_5(%arg0: i32) -> (i32, i32) {
    %c0_i32 = arith.constant 0 : i32
    %c0_i32_0 = arith.constant 0 : i32
    return %arg0, %c0_i32 : i32, i32
  }
}

</mosaic_0001>

<bundles_post_ra>
// kernel: neural_net_forward.1
= control target key start
LH: loop header
LB: loop body
LE: loop exit
PB: predicated region body
PF: predicated region fallthrough
CT: control target
= control target key end

     0   :  { %10 = vsyncpa [#allocation3], 0  ;;  %s1009_s18 = smov [#allocation2]   ;;  %s1135_s0 = inlined_call_operand.vmem [shape: f32[16,784], index: 0, kind: input, shape index: {}]   ;;  %s1136_s1 = inlined_call_operand.hbm [shape: bf16[784,128], index: 1, kind: input, shape index: {}]   ;;  %s1137_s2 = inlined_call_operand.vmem [shape: f32[1,128], index: 2, kind: input, shape index: {}]   ;;  %s1138_s3 = inlined_call_operand.vmem [shape: bf16[128,128], index: 3, kind: input, shape index: {}]   ;;  %s1139_s4 = inlined_call_operand.vmem [shape: f32[1,128], index: 4, kind: input, shape index: {}]   ;;  %s1140_s5 = inlined_call_operand.vmem [shape: bf16[16,128], index: 5, kind: output, shape index: {}]  }
   0x1   :  { %s18_s19 = sshll.u32 %s1009_s18, 4  ;;  %s19_s19 = int_to_ptr.vmem [resolvable:$true] %s18_s19 }
   0x2   :  { %s995_s20 = scalar_lea.vmem %s19_s19, 6272  ;;  %p1000_p1 = scmp.lt.s32.totalorder %s19_s19, %s19_s19 }
   0x3   :  { %p996_p0 = scmp.ne.s32.totalorder %s19_s19, %s995_s20  ;;  %p1001_p2 = scmp.lt.s32.totalorder %s995_s20, %s995_s20 }
   0x5   :  { %p1002_p3 = por %p1001_p2, %p1000_p1 }
   0x7   :  { %p1003_p4 = pnand %p1002_p3, %p996_p0 }
   0x9   :  { %1006 = shalt.err (!%p1003_p4)
}
   0xa   :  { %s1010_s21 = smov 64   ;;  %s1011_s22 = smov 4  }
   0xb   :  { %24 = dma.hbm_to_vmem [thread:$0]  %s1136_s1, 6272, %s19_s19, [#allocation3], %s1010_s21, %s1010_s21, %s1011_s22  }
   0xc   :  { %1007 = dma.done.wait [#allocation3], 6272  }
   0xd   :  { %1008 = vsyncadd [#allocation3], 4294961024  ;;  %v930_v0 = vld [vmem:[#allocation2 + $0x78] sm:$0xff]   ;;  %v934_v4 = vld [vmem:[#allocation2 + $0x70] sm:$0xff]   ;;  %v1012_v43 = vmov 0.0   ;;  %vm1013_vm0 = vmmov 0  }
   0xe   :  { %v931_v1 = vld [vmem:[#allocation2 + $0x38] sm:$0xff]   ;;  %822 = vmatprep.subr.bf16.mxu0 %v930_v0  ;;  %v935_v5 = vld [vmem:[#allocation2 + $0x30] sm:$0xff]   ;;  %v938_v8 = vld [vmem:[#allocation2 + $0x68] sm:$0xff]   ;;  %vm455_vm1 = vcmask 130048  }
   0xf   :  { %v932_v2 = vld [vmem:[#allocation2 + $0xf8] sm:$0xff]   ;;  %823 = vmatpush3.bf16.msra.mxu0 %v931_v1  ;;  %v936_v6 = vld [vmem:[#allocation2 + $0xf0] sm:$0xff]   ;;  %v939_v9 = vld [vmem:[#allocation2 + $0x28] sm:$0xff]  }
  0x10   :  { %v933_v3 = vld [vmem:[#allocation2 + $0xb8] sm:$0xff]   ;;  %844 = vmatprep.subr.bf16.mxu1 %v932_v2  ;;  %824 = vmatprep.subr.bf16.mxu0 %v934_v4  ;;  %v937_v7 = vld [vmem:[#allocation2 + $0xb0] sm:$0xff]   ;;  %v940_v10 = vld [vmem:[#allocation2 + $0xe8] sm:$0xff]  }
  0x11   :  { %845 = vmatpush3.bf16.msra.mxu1 %v933_v3  ;;  %v941_v11 = vld [vmem:[#allocation2 + $0xa8] sm:$0xff]   ;;  %v942_v12 = vld [vmem:[#allocation2 + $0x60] sm:$0xff]   ;;  %v946_v16 = vld [vmem:[#allocation2 + $0x58] sm:$0xff]  }
  0x12   :  { %846 = vmatprep.subr.bf16.mxu1 %v936_v6  ;;  %v943_v13 = vld [vmem:[#allocation2 + $0x20] sm:$0xff]   ;;  %v947_v17 = vld [vmem:[#allocation2 + $0x18] sm:$0xff]   ;;  %v950_v20 = vld [vmem:[#allocation2 + $0x50] sm:$0xff]  }
  0x13   :  { %825 = vmatpush3.bf16.msra.mxu0 %v935_v5  ;;  %v944_v14 = vld [vmem:[#allocation2 + $0xe0] sm:$0xff]   ;;  %v948_v18 = vld [vmem:[#allocation2 + $0xd8] sm:$0xff]   ;;  %v951_v21 = vld [vmem:[#allocation2 + $0x10] sm:$0xff]  }
  0x14   :  { %826 = vmatprep.subr.bf16.mxu0 %v938_v8  ;;  %v945_v15 = vld [vmem:[#allocation2 + $0xa0] sm:$0xff]   ;;  %v949_v19 = vld [vmem:[#allocation2 + $0x98] sm:$0xff]   ;;  %v952_v22 = vld [vmem:[#allocation2 + $0xd0] sm:$0xff]  }
  0x15   :  { %847 = vmatpush3.bf16.msra.mxu1 %v937_v7  ;;  %v953_v23 = vld [vmem:[#allocation2 + $0x90] sm:$0xff]   ;;  %v954_v24 = vld [vmem:[#allocation2 + $0x48] sm:$0xff]   ;;  %v958_v28 = vld [vmem:[#allocation2 + $0x40] sm:$0xff]  }
  0x16   :  { %848 = vmatprep.subr.bf16.mxu1 %v940_v10  ;;  %v955_v25 = vld [vmem:[#allocation2 + $0x8] sm:$0xff]   ;;  %v959_v29 = vld [vmem:[#allocation2] sm:$0xff]   ;;  %v42_v36 = vld [vmem:[%s1135_s0 + $0x38] sm:$0xff] }
  0x17   :  { %827 = vmatpush3.bf16.msra.mxu0 %v939_v9  ;;  %v956_v26 = vld [vmem:[#allocation2 + $0xc8] sm:$0xff]   ;;  %v960_v30 = vld [vmem:[#allocation2 + $0xc0] sm:$0xff]   ;;  %v962_v38 = vld [vmem:[#allocation2 + $0x178] sm:$0xff]  }
  0x18   :  { %828 = vmatprep.subr.bf16.mxu0 %v942_v12  ;;  %v957_v27 = vld [vmem:[#allocation2 + $0x88] sm:$0xff]   ;;  %v43_v32 = vld [vmem:[%s1135_s0 + $0x40] sm:$0xff]  ;;  %v38_v39 = vld [vmem:[%s1135_s0 + $0x18] sm:$0xff] }
  0x19   :  { %849 = vmatpush3.bf16.msra.mxu1 %v941_v11  ;;  %v36_v31 = vld [vmem:[%s1135_s0 + $0x8] sm:$0xff]  ;;  %v961_v34 = vld [vmem:[#allocation2 + $0x80] sm:$0xff]   ;;  %v45_v40 = vld [vmem:[%s1135_s0 + $0x50] sm:$0xff] }
  0x1a   :  { %850 = vmatprep.subr.bf16.mxu1 %v944_v14  ;;  %v50_v33 = vpack.c.bf16 %v43_v32, %v36_v31  ;;  %v35_v35 = vld [vmem:[%s1135_s0] sm:$0xff]  ;;  %v52_v41 = vpack.c.bf16 %v45_v40, %v38_v39  ;;  %v963_v42 = vld [vmem:[#allocation2 + $0x138] sm:$0xff]   ;;  %v37_v44 = vld [vmem:[%s1135_s0 + $0x10] sm:$0xff] }
  0x1b   :  { %829 = vmatpush3.bf16.msra.mxu0 %v943_v13  ;;  %v49_v37 = vpack.c.bf16 %v42_v36, %v35_v35  ;;  %v44_v45 = vld [vmem:[%s1135_s0 + $0x48] sm:$0xff]  ;;  %v964_v47 = vld [vmem:[#allocation2 + $0x170] sm:$0xff]   ;;  %v968_v51 = vld [vmem:[#allocation2 + $0x160] sm:$0xff]  }
  0x1c   :  { %830 = vmatprep.subr.bf16.mxu0 %v946_v16  ;;  %491 = vmatprep.mubr.bf16.mxu0 %v50_v33  ;;  %v51_v46 = vpack.c.bf16 %v44_v45, %v37_v44  ;;  %v965_v48 = vld [vmem:[#allocation2 + $0x130] sm:$0xff]   ;;  %v966_v49 = vld [vmem:[#allocation2 + $0x168] sm:$0xff]   ;;  %v969_v52 = vld [vmem:[#allocation2 + $0x120] sm:$0xff]  }
  0x1d   :  { %851 = vmatpush3.bf16.msra.mxu1 %v945_v15  ;;  %532 = vmatprep.mubr.bf16.mxu1 %v52_v41  ;;  %v967_v50 = vld [vmem:[#allocation2 + $0x128] sm:$0xff]   ;;  %v970_v53 = vld [vmem:[#allocation2 + $0x158] sm:$0xff]   ;;  %v972_v55 = vld [vmem:[#allocation2 + $0x150] sm:$0xff]  }
  0x1e   :  { %852 = vmatprep.subr.bf16.mxu1 %v948_v18  ;;  %v971_v54 = vld [vmem:[#allocation2 + $0x118] sm:$0xff]   ;;  %v978_v56 = vld [vmem:[#allocation2 + $0x180] sm:$0xff]   ;;  %v40_v57 = vld [vmem:[%s1135_s0 + $0x28] sm:$0xff] }
  0x1f   :  { %831 = vmatpush3.bf16.msra.mxu0 %v947_v17  ;;  %v973_v58 = vld [vmem:[#allocation2 + $0x110] sm:$0xff]   ;;  %v974_v59 = vld [vmem:[#allocation2 + $0x148] sm:$0xff]   ;;  %v47_v60 = vld [vmem:[%s1135_s0 + $0x60] sm:$0xff] }
  0x20   :  { %832 = vmatprep.subr.bf16.mxu0 %v950_v20  ;;  %v54_v61 = vpack.c.bf16 %v47_v60, %v40_v57  ;;  %v41_v62 = vld [vmem:[%s1135_s0 + $0x30] sm:$0xff]  ;;  %v48_v63 = vld [vmem:[%s1135_s0 + $0x68] sm:$0xff]  ;;  %v976_v2 = vld [vmem:[#allocation2 + $0x140] sm:$0xff]  }
  0x21   :  { %853 = vmatpush3.bf16.msra.mxu1 %v949_v19  ;;  %v55_v0 = vpack.c.bf16 %v48_v63, %v41_v62  ;;  %v975_v1 = vld [vmem:[#allocation2 + $0x108] sm:$0xff]   ;;  %v977_v3 = vld [vmem:[#allocation2 + $0x100] sm:$0xff]   ;;  %v46_v5 = vld [vmem:[%s1135_s0 + $0x58] sm:$0xff] }
  0x22   :  { %854 = vmatprep.subr.bf16.mxu1 %v952_v22  ;;  %v39_v4 = vld [vmem:[%s1135_s0 + $0x20] sm:$0xff]  ;;  %v979_v7 = vld [vmem:[%s1138_s3 + $0x38] sm:$0xff]   ;;  %v980_v8 = vld [vmem:[%s1138_s3 + $0x30] sm:$0xff]  }
  0x23   :  { %833 = vmatpush3.bf16.msra.mxu0 %v951_v21  ;;  %v53_v6 = vpack.c.bf16 %v46_v5, %v39_v4  ;;  %v981_v9 = vld [vmem:[%s1138_s3 + $0x28] sm:$0xff]   ;;  %v982_v10 = vld [vmem:[%s1138_s3 + $0x20] sm:$0xff]   ;;  %v983_v11 = vld [vmem:[%s1138_s3 + $0x18] sm:$0xff]  }
  0x24   :  { %834 = vmatprep.subr.bf16.mxu0 %v954_v24  ;;  %v984_v12 = vld [vmem:[%s1138_s3 + $0x10] sm:$0xff]   ;;  %v985_v13 = vld [vmem:[%s1138_s3 + $0x8] sm:$0xff]   ;;  %v986_v14 = vld [vmem:[%s1138_s3] sm:$0xff]  }
  0x25   :  { %855 = vmatpush3.bf16.msra.mxu1 %v953_v23 }
  0x26   :  { %856 = vmatprep.subr.bf16.mxu1 %v956_v26 }
  0x27   :  { %835 = vmatpush3.bf16.msra.mxu0 %v955_v25 }
  0x28   :  { %836 = vmatprep.subr.bf16.mxu0 %v958_v28 }
  0x29   :  { %857 = vmatpush3.bf16.msra.mxu1 %v957_v27  ;;  %v753_v27 = vld [vmem:[%s1137_s2] ss:$0 sm:$0xff] }
  0x2a   :  { %858 = vmatprep.subr.bf16.mxu1 %v960_v30 }
  0x2b   :  { %837 = vmatpush3.bf16.msra.mxu0 %v959_v29 }
  0x2c   :  { %866 = vmatprep.subr.bf16.mxu0 %v962_v38 }
  0x2d   :  { %859 = vmatpush3.bf16.msra.mxu1 %v961_v34 }
  0x2e   :  { %899 = vmatprep.subr.bf16.mxu1 %v1012_v43  ;;  %492 = vmatmul.mubr.bf16.vlgmr.msra.gmra.mxu0 %v49_v37 }
  0x2f   :  { %867 = vmatpush3.bf16.msra.mxu0 %v963_v42  ;;  %573 = vmatprep.mubr.bf16.mxu0 %v54_v61 }
  0x30   :  { %533 = vmatmul.mubr.bf16.vlgmr.msra.gmra.mxu1 %v51_v46  ;;  %868 = vmatprep.subr.bf16.mxu0 %v964_v47 }
  0x31   :  { %901 = vmatprep.mubr.msk.bf16.mxu1 %vm1013_vm0, %v1012_v43  ;;  %900 = vmatpush3.bf16.msra.mxu1 %v978_v56 }
  0x32   :  { %905 = vmatprep.subr.bf16.mxu1 %v1012_v43 }
  0x33   :  { %869 = vmatpush3.bf16.msra.mxu0 %v965_v48 }
  0x34   :  { %870 = vmatprep.subr.bf16.mxu0 %v966_v49 }
  0x37   :  { %871 = vmatpush3.bf16.msra.mxu0 %v967_v50  ;;  %v804_v50 = vld [vmem:[%s1139_s4] ss:$0 sm:$0xff] }
  0x38   :  { %872 = vmatprep.subr.bf16.mxu0 %v968_v51  ;;  %902 = vmatmul.mubr.msk.bf16.vlgmr.msra.gmra.mxu1 %vm455_vm1, %v55_v0 }
  0x39   :  { %921 = vmatprep.mubr.msk.bf16.mxu1 %vm1013_vm0, %v1012_v43  ;;  %906 = vmatpush3.bf16.msra.mxu1 %v979_v7 }
  0x3a   :  { %907 = vmatprep.subr.bf16.mxu1 %v1012_v43 }
  0x3b   :  { %873 = vmatpush3.bf16.msra.mxu0 %v969_v52 }
  0x3c   :  { %874 = vmatprep.subr.bf16.mxu0 %v970_v53 }
  0x3d   :  { %908 = vmatpush3.bf16.msra.mxu1 %v980_v8 }
  0x3e   :  { %909 = vmatprep.subr.bf16.mxu1 %v1012_v43 }
  0x3f   :  { %875 = vmatpush3.bf16.msra.mxu0 %v971_v54 }
  0x40   :  { %876 = vmatprep.subr.bf16.mxu0 %v972_v55 }
  0x41   :  { %910 = vmatpush3.bf16.msra.mxu1 %v981_v9 }
  0x42   :  { %911 = vmatprep.subr.bf16.mxu1 %v1012_v43 }
  0x43   :  { %877 = vmatpush3.bf16.msra.mxu0 %v973_v58 }
  0x44   :  { %878 = vmatprep.subr.bf16.mxu0 %v974_v59 }
  0x45   :  { %912 = vmatpush3.bf16.msra.mxu1 %v982_v10 }
  0x46   :  { %913 = vmatprep.subr.bf16.mxu1 %v1012_v43 }
  0x47   :  { %879 = vmatpush3.bf16.msra.mxu0 %v975_v1 }
  0x48   :  { %880 = vmatprep.subr.bf16.mxu0 %v976_v2 }
  0x49   :  { %914 = vmatpush3.bf16.msra.mxu1 %v983_v11 }
  0x4a   :  { %915 = vmatprep.subr.bf16.mxu1 %v1012_v43 }
  0x4b   :  { %881 = vmatpush3.bf16.msra.mxu0 %v977_v3 }
  0x4d   :  { %916 = vmatpush3.bf16.msra.mxu1 %v984_v12 }
  0x4e   :  { %574 = vmatmul.mubr.bf16.vlgmr.msra.gmra.mxu0 %v53_v6  ;;  %917 = vmatprep.subr.bf16.mxu1 %v1012_v43 }
  0x51   :  { %918 = vmatpush3.bf16.msra.mxu1 %v985_v13 }
  0x52   :  { %919 = vmatprep.subr.bf16.mxu1 %v1012_v43 }
  0x55   :  { %920 = vmatpush3.bf16.msra.mxu1 %v986_v14 }
  0xee   :  { %v838_v18 = vpop.f32.mrf.mxu0 }
  0xf0   :  { %v860_v15 = vpop.f32.mrf.mxu1  ;;  %v839_v20 = vpop.f32.mrf.mxu0 }
  0xf1   :  { %v840_v26 = vadd.f32 %v839_v20, %v838_v18 }
  0xf2   :  { %v861_v16 = vpop.f32.mrf.mxu1  ;;  %v841_v23 = vpop.f32.mrf.mxu0 }
  0xf3   :  { %v494_v29 = vadd.f32 %v840_v26, %v753_v27  ;;  %v862_v30 = vadd.f32 %v861_v16, %v860_v15 }
  0xf4   :  { %v863_v17 = vpop.f32.mrf.mxu1  ;;  %v842_v28 = vpop.f32.mrf.mxu0 }
  0xf5   :  { %v843_v31 = vadd.f32 %v842_v28, %v841_v23  ;;  %v535_v34 = vadd.f32 %v862_v30, %v494_v29 }
  0xf6   :  { %v864_v19 = vpop.f32.mrf.mxu1 }
  0xf7   :  { %v497_v35 = vadd.f32 %v843_v31, %v753_v27  ;;  %v865_v36 = vadd.f32 %v864_v19, %v863_v17 }
  0xf8   :  { %v616_v21 = vpop.f32.mrf.mxu1 }
  0xf9   :  { %v538_v41 = vadd.f32 %v865_v36, %v497_v35 }
  0xfa   :  { %v903_v22 = vpop.f32.mrf.mxu1 }
  0xfc   :  { %v619_v24 = vpop.f32.mrf.mxu1 }
  0xfe   :  { %v904_v25 = vpop.f32.mrf.mxu1 }
 0x10e   :  { %v882_v32 = vpop.f32.mrf.mxu0 }
 0x110   :  { %v883_v33 = vpop.f32.mrf.mxu0 }
 0x111   :  { %v884_v37 = vadd.f32 %v883_v33, %v882_v32 }
 0x112   :  { %v885_v38 = vpop.f32.mrf.mxu0 }
 0x113   :  { %v576_v39 = vadd.f32 %v884_v37, %v535_v34 }
 0x114   :  { %v886_v40 = vpop.f32.mrf.mxu0 }
 0x115   :  { %v887_v42 = vadd.f32 %v886_v40, %v885_v38  ;;  %v617_v43 = vadd.f32 %v616_v21, %v576_v39 }
 0x117   :  { %v579_v44 = vadd.f32 %v887_v42, %v538_v41  ;;  %v623_v46 = vmax.f32 %v617_v43, 0.0 }
 0x119   :  { %v620_v45 = vadd.f32 %v619_v24, %v579_v44 }
 0x11b   :  { %v624_v47 = vmax.f32 %v620_v45, 0.0 }
 0x11d   :  { %v625_v48 = vpack.c.bf16 %v624_v47, %v623_v46 }
 0x11f   :  { %922 = vmatmul.mubr.bf16.vlgmr.msra.gmra.mxu1 %v625_v48 }
 0x1df   :  { %v731_v49 = vpop.f32.mrf.mxu1 }
 0x1e0   :  { %v732_v53 = vadd.f32 %v804_v50, %v731_v49 }
 0x1e1   :  { %v923_v51 = vpop.f32.mrf.mxu1 }
 0x1e3   :  { %v734_v52 = vpop.f32.mrf.mxu1 }
 0x1e4   :  { %v735_v54 = vadd.f32 %v804_v50, %v734_v52 }
 0x1e5   :  { %v924_v55 = vpop.f32.mrf.mxu1 }
 0x1e6   :  { %v820_v56 = vpack.c.bf16 %v735_v54, %v732_v53 }
 0x1e8   :  { %821 = vst [vmem:[%s1140_s5] sm:$0xff] %v820_v56  }
 0x1e9   :  { %752 = vsyncpa [#allocation3], 1 }

</bundles_post_ra>
